<compile_context>
chip_gen: v6e
topology: v6e:2x2x1
jax: 0.10.0
libtpu: 0.0.40
codegen_flags: <defaults>
</compile_context>

<pallas_src>
import functools
import math

import jax
import jax.numpy as jnp
import numpy as np
from jax.experimental import pallas as pl
from jax.experimental.pallas import tpu as pltpu


def _pick_tile(dim, target):
    """Largest tile <= target that evenly divides `dim` (full dim if it fits)."""
    if dim <= target:
        return dim
    for t in range(target, 0, -1):
        if dim % t == 0:
            return t
    return dim


# ---------------------------------------------------------------------------
# Kernel 1: Conv1D (== addmm):  out = x @ W + b   (tiled / pipelined)
# ---------------------------------------------------------------------------
def linear_kernel(x_ref, w_ref, b_ref, o_ref, acc_ref):
    k = pl.program_id(2)

    @pl.when(k == 0)
    def _():
        acc_ref[...] = jnp.zeros_like(acc_ref)

    acc_ref[...] += jnp.dot(x_ref[...], w_ref[...],
                            preferred_element_type=jnp.float32)

    @pl.when(k == pl.num_programs(2) - 1)
    def _():
        o_ref[...] = (acc_ref[...] + b_ref[...].astype(jnp.float32)).astype(o_ref.dtype)


def conv1d_linear(x2d, w, b, *, tm=256, tn=256, tk=512):
    """x2d: (M, K), w: (K, N), b: (N,) -> (M, N)."""
    M, K = x2d.shape
    N = w.shape[1]
    tm = _pick_tile(M, tm)
    tn = _pick_tile(N, tn)
    tk = _pick_tile(K, tk)
    return pl.pallas_call(
        linear_kernel,
        out_shape=jax.ShapeDtypeStruct((M, N), x2d.dtype),
        grid=(M // tm, N // tn, K // tk),
        in_specs=[
            pl.BlockSpec((tm, tk), lambda i, j, k: (i, k)),
            pl.BlockSpec((tk, tn), lambda i, j, k: (k, j)),
            pl.BlockSpec((1, tn), lambda i, j, k: (0, j)),
        ],
        out_specs=pl.BlockSpec((tm, tn), lambda i, j, k: (i, j)),
        scratch_shapes=[pltpu.VMEM((tm, tn), jnp.float32)],
        compiler_params=pltpu.CompilerParams(
            dimension_semantics=("parallel", "parallel", "arbitrary")),
    )(x2d, w, b.reshape(1, N))


# ---------------------------------------------------------------------------
# Kernel 2: flash-style causal attention, all heads per (batch, q-tile) step.
#   q,k,v blocks: (1, H, tq/tkv, D);  output block: (1, tq, H*D)  (lane-dense)
# ---------------------------------------------------------------------------
def flash_attn_kernel(q_ref, k_ref, v_ref, o_ref, m_ref, l_ref, acc_ref,
                      *, num_heads, head_dim, tq, tkv, scale):
    qi = pl.program_id(1)
    ki = pl.program_id(2)

    @pl.when(ki == 0)
    def _():
        m_ref[...] = jnp.full_like(m_ref, -jnp.inf)
        l_ref[...] = jnp.zeros_like(l_ref)
        acc_ref[...] = jnp.zeros_like(acc_ref)

    # Skip KV blocks that lie entirely above the causal diagonal for this q-tile.
    @pl.when(ki * tkv <= qi * tq + (tq - 1))
    def _():
        q = q_ref[0]            # (H, tq,  D)
        k = k_ref[0]            # (H, tkv, D)   -- un-transposed; contract over D
        v = v_ref[0]            # (H, tkv, D)

        s = jnp.einsum('hqd,hkd->hqk', q, k,
                       preferred_element_type=jnp.float32)      # (H, tq, tkv)
        if scale:
            s = s * (1.0 / math.sqrt(head_dim))

        # Causal mask generated in-kernel; matches torch's w*b - 10000*(1-b):
        # masked entries become exactly -10000 (after scaling), kept entries s.
        row = qi * tq + jax.lax.broadcasted_iota(jnp.int32, (1, tq, tkv), 1)
        col = ki * tkv + jax.lax.broadcasted_iota(jnp.int32, (1, tq, tkv), 2)
        s = jnp.where(col <= row, s, -10000.0)

        m_prev = m_ref[...]                                      # (H, tq, 1)
        m_new = jnp.maximum(m_prev, s.max(axis=-1, keepdims=True))
        alpha = jnp.exp(m_prev - m_new)
        p = jnp.exp(s - m_new)
        l_ref[...] = alpha * l_ref[...] + p.sum(axis=-1, keepdims=True)
        acc_ref[...] = alpha * acc_ref[...] + jnp.einsum(
            'hqk,hkd->hqd', p.astype(v.dtype), v,
            preferred_element_type=jnp.float32)
        m_ref[...] = m_new

    @pl.when(ki == pl.num_programs(2) - 1)
    def _():
        out = acc_ref[...] * pl.reciprocal(l_ref[...], approx=True)  # (H, tq, D)
        out = out.astype(o_ref.dtype)
        # Write merged-head, lane-dense (tq, H*D) output block.
        for h in range(num_heads):
            o_ref[0, :, h * head_dim:(h + 1) * head_dim] = out[h]


def attention_core(q, k, v, *, scale, tq=128, tkv=128):
    """q, k, v: (B, H, T, D) -> output already merged: (B, T, H*D)."""
    B, H, T, D = q.shape
    nx = H * D
    tq = _pick_tile(T, tq)
    tkv = _pick_tile(T, tkv)
    kernel = functools.partial(flash_attn_kernel, num_heads=H, head_dim=D,
                               tq=tq, tkv=tkv, scale=scale)
    return pl.pallas_call(
        kernel,
        out_shape=jax.ShapeDtypeStruct((B, T, nx), q.dtype),
        grid=(B, T // tq, T // tkv),
        in_specs=[
            pl.BlockSpec((1, H, tq, D), lambda b, qi, ki: (b, 0, qi, 0)),
            pl.BlockSpec((1, H, tkv, D), lambda b, qi, ki: (b, 0, ki, 0)),
            pl.BlockSpec((1, H, tkv, D), lambda b, qi, ki: (b, 0, ki, 0)),
        ],
        out_specs=pl.BlockSpec((1, tq, nx), lambda b, qi, ki: (b, qi, 0)),
        scratch_shapes=[
            pltpu.VMEM((H, tq, 1), jnp.float32),   # running max m
            pltpu.VMEM((H, tq, 1), jnp.float32),   # running sum l
            pltpu.VMEM((H, tq, D), jnp.float32),   # output accumulator
        ],
        compiler_params=pltpu.CompilerParams(
            dimension_semantics=("parallel", "parallel", "arbitrary")),
    )(q, k, v)


# ---------------------------------------------------------------------------
# Full Attention.forward (eval mode, no layer_past / attention_mask / head_mask)
# ---------------------------------------------------------------------------
def attention_forward(x, params, *, n_head, scale=True):
    B, T, nx = x.shape
    D = nx // n_head

    # c_attn: (B*T, nx) @ (nx, 3*nx) + bias
    qkv = conv1d_linear(x.reshape(-1, nx), params["c_attn_w"], params["c_attn_b"])
    qkv = qkv.reshape(B, T, 3 * nx)
    query, key, value = jnp.split(qkv, 3, axis=2)

    # split_heads; key stays (B, H, T, D) -- no (B,H,D,T) transpose needed,
    # the QK^T contraction is done over D inside the kernel.
    q = query.reshape(B, T, n_head, D).transpose(0, 2, 1, 3)
    k = key.reshape(B, T, n_head, D).transpose(0, 2, 1, 3)
    v = value.reshape(B, T, n_head, D).transpose(0, 2, 1, 3)

    # present = stack(key.transpose(-2,-1), value) == stack(k_bhtd, v_bhtd)
    present = jnp.stack([k, v])

    # Flash attention; result comes back already merged as (B, T, nx).
    a = attention_core(q, k, v, scale=scale)

    # c_proj
    a = conv1d_linear(a.reshape(-1, nx), params["c_proj_w"], params["c_proj_b"])
    a = a.reshape(B, T, nx)

    # attn_dropout / resid_dropout are identity in eval mode
    return a, present


# ---------------------------------------------------------------------------
# Pure-JAX reference (mirrors the PyTorch code path) for correctness checking
# ---------------------------------------------------------------------------
def attention_reference(x, params, *, n_head, scale=True):
    B, T, nx = x.shape
    D = nx // n_head
    qkv = x.reshape(-1, nx) @ params["c_attn_w"] + params["c_attn_b"]
    qkv = qkv.reshape(B, T, 3 * nx)
    query, key, value = jnp.split(qkv, 3, axis=2)
    q = query.reshape(B, T, n_head, D).transpose(0, 2, 1, 3)
    k = key.reshape(B, T, n_head, D).transpose(0, 2, 3, 1)     # (B,H,D,T) as in torch
    v = value.reshape(B, T, n_head, D).transpose(0, 2, 1, 3)
    present = jnp.stack([jnp.swapaxes(k, -2, -1), v])
    w = jnp.einsum("bhtd,bhds->bhts", q, k)
    if scale:
        w = w / math.sqrt(D)
    b = jnp.tril(jnp.ones((T, T), dtype=x.dtype))
    w = w * b - 10000.0 * (1 - b)
    w = jax.nn.softmax(w, axis=-1)
    a = jnp.einsum("bhts,bhsd->bhtd", w, v)
    a = a.transpose(0, 2, 1, 3).reshape(B, T, nx)
    a = a.reshape(-1, nx) @ params["c_proj_w"] + params["c_proj_b"]
    return a.reshape(B, T, nx), present


# ---------------------------------------------------------------------------
if __name__ == "__main__":
    # Small GPT-2-like config: nx=32, n_head=4 (head_dim=8), seq=8, batch=2
    B, T, nx, n_head = 2, 8, 32, 4
    scale = True

    key = jax.random.PRNGKey(0)
    k_x, k_wa, k_wp = jax.random.split(key, 3)

    # Deterministic parameter init (Conv1D: weight ~ N(0, 0.02), bias = 0)
    params = {
        "c_attn_w": 0.02 * jax.random.normal(k_wa, (nx, 3 * nx), dtype=jnp.float32),
        "c_attn_b": jnp.zeros((3 * nx,), dtype=jnp.float32),
        "c_proj_w": 0.02 * jax.random.normal(k_wp, (nx, nx), dtype=jnp.float32),
        "c_proj_b": jnp.zeros((nx,), dtype=jnp.float32),
    }

    x = jax.random.normal(k_x, (B, T, nx), dtype=jnp.float32)

    a, present = attention_forward(x, params, n_head=n_head, scale=scale)
    a = jax.block_until_ready(a)
    present = jax.block_until_ready(present)

    a_ref, present_ref = attention_reference(x, params, n_head=n_head, scale=scale)

    assert a.shape == (B, T, nx)
    assert present.shape == (2, B, n_head, T, nx // n_head)
    # pl.reciprocal(approx=True) introduces ~1e-4 relative error in the softmax
    # normalization, so the activation check uses a slightly looser tolerance.
    np.testing.assert_allclose(np.asarray(a), np.asarray(a_ref), rtol=1e-3, atol=1e-3)
    np.testing.assert_allclose(
        np.asarray(present), np.asarray(present_ref), rtol=1e-5, atol=1e-5
    )

    print("KERNEL_OK")
</pallas_src>

<mosaic_0001>
module attributes {stable_mosaic.version = 11 : i64} {
  func.func @linear_kernel(%arg0: i32, %arg1: i32, %arg2: i32, %arg3: memref<16x32xf32, #tpu.memory_space<vmem>>, %arg4: memref<32x96xf32, #tpu.memory_space<vmem>>, %arg5: memref<1x96xf32, #tpu.memory_space<vmem>>, %arg6: memref<16x96xf32, #tpu.memory_space<vmem>>, %arg7: memref<16x96xf32, #tpu.memory_space<vmem>>) attributes {dimension_semantics = [#tpu.dimension_semantics<parallel>, #tpu.dimension_semantics<parallel>, #tpu.dimension_semantics<arbitrary>], iteration_bounds = array<i64: 1, 1, 1>, scalar_prefetch = 0 : i64, scratch_operands = 1 : i64, tpu.core_type = #tpu.core_type<tc>, window_params = [{transform_indices = @transform_0, window_bounds = array<i64: 16, 32>}, {transform_indices = @transform_1, window_bounds = array<i64: 32, 96>}, {transform_indices = @transform_2, window_bounds = array<i64: 1, 96>}, {transform_indices = @transform_3, window_bounds = array<i64: 16, 96>}]} {
    %c0_i32 = arith.constant 0 : i32
    %0 = arith.cmpi eq, %arg2, %c0_i32 : i32
    %1 = arith.extui %0 : i1 to i32
    %c0_i32_0 = arith.constant 0 : i32
    %2 = arith.cmpi ne, %1, %c0_i32_0 : i32
    scf.if %2 {
      %cst_10 = arith.constant 0.000000e+00 : f32
      %12 = vector.broadcast %cst_10 : f32 to vector<16x96xf32>
      %c0_11 = arith.constant 0 : index
      %c0_12 = arith.constant 0 : index
      %13 = vector.load %arg7[%c0_11, %c0_12] : memref<16x96xf32, #tpu.memory_space<vmem>>, vector<16x96xf32>
      tpu.vector_store %arg7[%c0_11, %c0_12], %12 {strides = array<i32>} : memref<16x96xf32, #tpu.memory_space<vmem>>, vector<16x96xf32>,
    } else {
    }
    %c0 = arith.constant 0 : index
    %c0_1 = arith.constant 0 : index
    %3 = vector.load %arg7[%c0, %c0_1] : memref<16x96xf32, #tpu.memory_space<vmem>>, vector<16x96xf32>
    %c0_2 = arith.constant 0 : index
    %c0_3 = arith.constant 0 : index
    %4 = vector.load %arg3[%c0_2, %c0_3] : memref<16x32xf32, #tpu.memory_space<vmem>>, vector<16x32xf32>
    %c0_4 = arith.constant 0 : index
    %c0_5 = arith.constant 0 : index
    %5 = vector.load %arg4[%c0_4, %c0_5] : memref<32x96xf32, #tpu.memory_space<vmem>>, vector<32x96xf32>
    %cst = arith.constant dense<0.000000e+00> : vector<16x96xf32>
    %6 = tpu.matmul %4, %5, %cst {dimension_numbers = #tpu.dot_dimension_numbers<[1], [0], [0], [1], [0, 0, 1, 1], [], []>} : vector<16x32xf32>, vector<32x96xf32>, vector<16x96xf32> -> vector<16x96xf32>
    %7 = arith.addf %3, %6 : vector<16x96xf32>
    %c0_6 = arith.constant 0 : index
    %c0_7 = arith.constant 0 : index
    %8 = vector.load %arg7[%c0_6, %c0_7] : memref<16x96xf32, #tpu.memory_space<vmem>>, vector<16x96xf32>
    tpu.vector_store %arg7[%c0_6, %c0_7], %7 {strides = array<i32>} : memref<16x96xf32, #tpu.memory_space<vmem>>, vector<16x96xf32>,
    %c0_i32_8 = arith.constant 0 : i32
    %9 = arith.cmpi eq, %arg2, %c0_i32_8 : i32
    %10 = arith.extui %9 : i1 to i32
    %c0_i32_9 = arith.constant 0 : i32
    %11 = arith.cmpi ne, %10, %c0_i32_9 : i32
    scf.if %11 {
      %c0_10 = arith.constant 0 : index
      %c0_11 = arith.constant 0 : index
      %12 = vector.load %arg7[%c0_10, %c0_11] : memref<16x96xf32, #tpu.memory_space<vmem>>, vector<16x96xf32>
      %c0_12 = arith.constant 0 : index
      %c0_13 = arith.constant 0 : index
      %13 = vector.load %arg5[%c0_12, %c0_13] : memref<1x96xf32, #tpu.memory_space<vmem>>, vector<1x96xf32>
      %14 = vector.broadcast %13 : vector<1x96xf32> to vector<16x96xf32>
      %15 = arith.addf %12, %14 : vector<16x96xf32>
      %c0_14 = arith.constant 0 : index
      %c0_15 = arith.constant 0 : index
      %16 = vector.load %arg6[%c0_14, %c0_15] : memref<16x96xf32, #tpu.memory_space<vmem>>, vector<16x96xf32>
      tpu.vector_store %arg6[%c0_14, %c0_15], %15 {strides = array<i32>} : memref<16x96xf32, #tpu.memory_space<vmem>>, vector<16x96xf32>,
    } else {
    }
    return
  }
  func.func @transform_0(%arg0: i32, %arg1: i32, %arg2: i32) -> (i32, i32) {
    %c0_i32 = arith.constant 0 : i32
    return %arg0, %arg2 : i32, i32
  }
  func.func @transform_1(%arg0: i32, %arg1: i32, %arg2: i32) -> (i32, i32) {
    %c0_i32 = arith.constant 0 : i32
    return %arg2, %arg1 : i32, i32
  }
  func.func @transform_2(%arg0: i32, %arg1: i32, %arg2: i32) -> (i32, i32) {
    %c0_i32 = arith.constant 0 : i32
    %c0_i32_0 = arith.constant 0 : i32
    return %c0_i32, %arg1 : i32, i32
  }
  func.func @transform_3(%arg0: i32, %arg1: i32, %arg2: i32) -> (i32, i32) {
    %c0_i32 = arith.constant 0 : i32
    return %arg0, %arg1 : i32, i32
  }
}

</mosaic_0001>

<bundles_post_ra>
// kernel: tpu_custom_call.1
= control target key start
LH: loop header
LB: loop body
LE: loop exit
PB: predicated region body
PF: predicated region fallthrough
CT: control target
= control target key end

     0   :  { %8 = vsyncpa [#allocation4], 0  ;;  %s326_s0 = inlined_call_operand.hbm [shape: f32[16,32], index: 0, kind: input, shape index: {}]   ;;  %s327_s1 = inlined_call_operand.hbm [shape: f32[32,96], index: 1, kind: input, shape index: {}]   ;;  %s328_s2 = inlined_call_operand.vmem [shape: f32[1,96], index: 2, kind: input, shape index: {}]   ;;  %s329_s3 = inlined_call_operand.hbm [shape: f32[16,96], index: 3, kind: output, shape index: {}]  }
   0x1   :  { %9 = vsyncpa [#allocation7], 0 }
   0x2   :  { %10 = vsyncpa [#allocation5], 0  ;;  %s271_s12 = smov [#allocation3]  }
   0x3   :  { %s16_s13 = sshll.u32 %s271_s12, 4  ;;  %s17_s13 = int_to_ptr.vmem [resolvable:$true] %s16_s13 }
   0x4   :  { %s213_s14 = scalar_lea.vmem %s17_s13, 256  ;;  %p218_p1 = scmp.lt.s32.totalorder %s17_s13, %s17_s13 }
   0x5   :  { %p214_p0 = scmp.ne.s32.totalorder %s17_s13, %s213_s14  ;;  %p219_p2 = scmp.lt.s32.totalorder %s213_s14, %s213_s14 }
   0x7   :  { %p220_p3 = por %p219_p2, %p218_p1 }
   0x9   :  { %p221_p4 = pnand %p220_p3, %p214_p0 }
   0xb   :  { %224 = shalt.err (!%p221_p4)
}
   0xc   :  { %s272_s15 = smov 128   ;;  %s273_s16 = smov 8  }
   0xd   :  { %22 = dma.hbm_to_vmem [thread:$0]  %s326_s0, 256, %s17_s13, [#allocation4], %s272_s15, %s272_s15, %s273_s16  }
   0xe   :  { %s274_s19 = smov [#allocation6]  }
   0xf   :  { %s28_s20 = sshll.u32 %s274_s19, 4  ;;  %s29_s20 = int_to_ptr.vmem [resolvable:$true] %s28_s20 }
  0x10   :  { %s233_s21 = scalar_lea.vmem %s29_s20, 512  ;;  %p238_p6 = scmp.lt.s32.totalorder %s29_s20, %s29_s20 }
  0x11   :  { %p234_p5 = scmp.ne.s32.totalorder %s29_s20, %s233_s21  ;;  %p239_p7 = scmp.lt.s32.totalorder %s233_s21, %s233_s21 }
  0x13   :  { %p240_p8 = por %p239_p7, %p238_p6 }
  0x15   :  { %p241_p9 = pnand %p240_p8, %p234_p5 }
  0x17   :  { %244 = shalt.err (!%p241_p9)
}
  0x18   :  { %34 = dma.hbm_to_vmem [thread:$0]  %s327_s1, 512, %s29_s20, [#allocation7], %s272_s15, %s272_s15, %s273_s16  }
  0x19   :  { %265 = dma.done.wait [#allocation4], 256  }
  0x1a   :  { %266 = vsyncadd [#allocation4], 4294967040 }
  0x1b   :  { %267 = dma.done.wait [#allocation7], 512  }
  0x1c   :  { %268 = vsyncadd [#allocation7], 4294966784  ;;  %vm47_vm0 = vcmask 785408   ;;  %v275_v0 = vmov 0.0   ;;  %vm58_vm1 = vcmask 261120   ;;  %v57_v1 = vld [vmem:[#allocation6 + $0x18] sm:$0xff] }
  0x1d   :  { %49 = vst.msk [vmem:[#allocation2 + $0x8] sm:$0xff] %vm47_vm0, %v275_v0  ;;  %48 = vst.msk [vmem:[#allocation2] sm:$0xff] %vm47_vm0, %v275_v0  ;;  %v56_v2 = vld [vmem:[#allocation6 + $0x10] sm:$0xff]  ;;  %188 = vmatprep.subr.mxu0 %v57_v1  ;;  %v55_v4 = vld [vmem:[#allocation6 + $0x8] sm:$0xff]  ;;  %s276_s24 = smov [#allocation8]  }
  0x1e   :  { %v52_v3 = vld [vmem:[#allocation3] sm:$0xff]  ;;  %189 = vmatpush3.msra.mxu0 %v57_v1  ;;  %v54_v5 = vld [vmem:[#allocation6] sm:$0xff]  ;;  %v53_v6 = vld [vmem:[#allocation3 + $0x8] sm:$0xff]  ;;  %s166_s25 = sshll.u32 %s276_s24, 4  ;;  %s167_s25 = int_to_ptr.vmem [resolvable:$true] %s166_s25 }
  0x1f   :  { %196 = vmatprep.mubr.msk.f32.mxu0 %vm58_vm1, %v52_v3  ;;  %190 = vmatprep.subr.mxu0 %v56_v2  ;;  %v181_v13 = vld [vmem:[%s328_s2] ss:$0 sm:$0xff]  ;;  %s245_s26 = scalar_lea.vmem %s167_s25, 256  ;;  %p250_p11 = scmp.lt.s32.totalorder %s167_s25, %s167_s25 }
  0x20   :  { %191 = vmatpush3.msra.mxu0 %v56_v2  ;;  %p246_p10 = scmp.ne.s32.totalorder %s167_s25, %s245_s26  ;;  %p251_p12 = scmp.lt.s32.totalorder %s245_s26, %s245_s26 }
  0x21   :  { %192 = vmatprep.subr.mxu0 %v55_v4 }
  0x22   :  { %193 = vmatpush3.msra.mxu0 %v55_v4  ;;  %p252_p13 = por %p251_p12, %p250_p11 }
  0x23   :  { %194 = vmatprep.subr.mxu0 %v54_v5 }
  0x24   :  { %195 = vmatpush3.msra.mxu0 %v54_v5  ;;  %v51_v7 = vld [vmem:[#allocation2 + $0x8] sm:$0xff]  ;;  %v50_v9 = vld [vmem:[#allocation2] sm:$0xff]  ;;  %p253_p0 = pnand %p252_p13, %p246_p10 }
  0x25   :  { %197 = vmatmul.mubr.msk.f32.vlgmr.msra.gmra.mxu0 %vm58_vm1, %v53_v6 }
  0xe5   :  { %v198_v8 = vpop.f32.mrf.mxu0 }
  0xe6   :  { %v141_v10 = vadd.f32 %v198_v8, %v51_v7 }
  0xe7   :  { %v131_v11 = vpop.f32.mrf.mxu0 }
  0xe8   :  { %144 = vst.msk [vmem:[#allocation2 + $0x8] sm:$0xff] %vm47_vm0, %v141_v10  ;;  %v140_v12 = vadd.f32 %v131_v11, %v50_v9 }
  0xea   :  { %143 = vst.msk [vmem:[#allocation2] sm:$0xff] %vm47_vm0, %v140_v12 }
  0xef   :  { %v149_v14 = vld [vmem:[#allocation2 + $0x8] sm:$0xff] }
  0xf0   :  { %v158_v15 = vadd.f32 %v181_v13, %v149_v14 }
  0xf1   :  { %v148_v16 = vld [vmem:[#allocation2] sm:$0xff] }
  0xf2   :  { %v157_v17 = vadd.f32 %v181_v13, %v148_v16  ;;  %160 = vst.msk [vmem:[#allocation8 + $0x8] sm:$0xff] %vm47_vm0, %v158_v15 }
  0xf4   :  { %159 = vst.msk [vmem:[#allocation8] sm:$0xff] %vm47_vm0, %v157_v17 }
  0xf5   :  { %256 = shalt.err (!%p253_p0)
}
  0xf6   :  { %172 = dma.vmem_to_hbm [thread:$0]  %s167_s25, 256, %s329_s3, [#allocation5], %s272_s15, %s272_s15, %s273_s16  }
  0xf7   :  { %269 = dma.done.wait [#allocation5], 256  }
  0xf8   :  { %270 = vsyncadd [#allocation5], 4294967040 }
  0xf9   :  { %176 = vsyncpa [#allocation4], 1 }
  0xfa   :  { %177 = vsyncpa [#allocation7], 1 }
  0xfb   :  { %178 = vsyncpa [#allocation5], 1 }

</bundles_post_ra>
